<compile_context>
chip_gen: v7x
topology: tpu7x:2x2x1
jax: 0.10.0
libtpu: 0.0.40
codegen_flags: <defaults>
</compile_context>

<pallas_src>
import jax
import jax.numpy as jnp
from jax.experimental import pallas as pl
from jax.experimental.pallas import tpu as pltpu


def _round_up(v, m):
    return (v + m - 1) // m * m


# ----------------------------------------------------------------------------
# Weight lowering: conv over (KW, Cin) with 'same' W-padding -> banded matrix
# ----------------------------------------------------------------------------
def _band_weight(w, width, k_pad, n_pad):
    """w: (KH, KW, Cin, Cout) HWIO -> (KH, k_pad, n_pad) banded matrices with
    stride-1 'same' padding along W folded in, such that

        y[h, wo*Cout + co] = sum_kh  x[h - ph + kh, :] @ band[kh]

    where x rows are lane-dense (width*Cin) UNPADDED along W and out-of-range
    W taps are dropped (i.e. zero padding)."""
    kh_, kw_, cin, cout = w.shape
    pw = (kw_ - 1) // 2
    bands = []
    for kh in range(kh_):
        acc = jnp.zeros((width * cin, width * cout), w.dtype)
        for kw in range(kw_):
            s = kw - pw                                   # input col = out col + s
            lo, hi = max(0, -s), min(width, width - s)    # valid output cols
            if hi <= lo:
                continue
            d = jnp.kron(jnp.eye(hi - lo, dtype=w.dtype), w[kh, kw])
            acc = acc + jnp.pad(
                d, (((lo + s) * cin, (width - hi - s) * cin),
                    (lo * cout, (width - hi) * cout)))
        bands.append(acc)
    band = jnp.stack(bands, axis=0)
    return jnp.pad(band, ((0, 0), (0, k_pad - width * cin),
                          (0, n_pad - width * cout)))


def _lane_row(v, width, n_pad):
    """Per-channel vector -> lane-dense (1, n_pad) f32 row tiled along W."""
    return jnp.pad(jnp.tile(v.astype(jnp.float32), width),
                   (0, n_pad - width * v.shape[0])).reshape(1, n_pad)


# ----------------------------------------------------------------------------
# Fused (Conv3x3 + BN(eval) + ReLU) x 2  — the whole unetConv2 forward
# ----------------------------------------------------------------------------
def unet_conv2_forward(params, x):
    """x: (N, H, W, Cin) NHWC f32 -> (N, H, W, Cout) f32."""
    w1, s1, b1 = params["conv1"]
    w2, s2, b2 = params["conv2"]
    N, H, W, Cin = x.shape
    KH, KW, _, C1 = w1.shape
    C2 = w2.shape[3]
    # Banded formulation assumes odd kernel, stride 1, 'same' padding.
    assert (KH, KW) == (3, 3) and w2.shape[:3] == (3, 3, C1), "3x3 stride-1 'same' only"
    ph = (KH - 1) // 2
    Hout = H

    # ---- tiling (big M tile; Hout padded to a multiple of TH) --------------
    TH = min(Hout, 128)                       # output-row tile per grid step
    Hgrid = pl.cdiv(Hout, TH)
    Hpad = Hgrid * TH                         # grid-covered output rows
    THE = TH + 2 * ph                         # layer-1 rows incl. conv2 halo
    KC1 = _round_up(W * Cin, 128)             # layer-1 K   (128-aligned lanes)
    LC1 = _round_up(W * C1, 128)              # layer-1 out / layer-2 K width
    LC2 = _round_up(W * C2, 128)              # layer-2 out row width
    Hpp = Hpad + 2 * (ph + 1)                 # input rows incl. halos of both convs

    # ---- wrapper-side layout prep (layout only, no math) --------------------
    xpp = jnp.pad(x, ((0, 0), (ph + 1, ph + 1 + (Hpad - Hout)), (0, 0), (0, 0)))
    xpp = xpp.reshape(N, Hpp, W * Cin)
    xpp = jnp.pad(xpp, ((0, 0), (0, 0), (0, KC1 - W * Cin))).astype(jnp.bfloat16)

    band1 = _band_weight(w1, W, KC1, LC1).astype(jnp.bfloat16)    # (KH, KC1, LC1)
    band2 = _band_weight(w2, W, LC1, LC2).astype(jnp.bfloat16)    # (KH, LC1, LC2)
    s1r, b1r = _lane_row(s1, W, LC1), _lane_row(b1, W, LC1)
    s2r, b2r = _lane_row(s2, W, LC2), _lane_row(b2, W, LC2)

    def kernel(x_ref, w1_ref, w2_ref, s1_ref, b1_ref, s2_ref, b2_ref, o_ref):
        row0 = pl.multiple_of(pl.program_id(1) * TH, TH)
        # One window load per step; KH taps are slices of the loaded value.
        xw = x_ref[0, pl.ds(row0, THE + KH - 1), :]               # (TH+4, KC1)

        # ---- conv1 (KH bf16 MXU matmuls, f32 acc) + BN + ReLU, with halo ----
        acc1 = jnp.zeros((THE, LC1), jnp.float32)
        for kh in range(KH):
            acc1 = acc1 + jnp.dot(xw[kh:kh + THE, :], w1_ref[kh],
                                  preferred_element_type=jnp.float32)
        y1 = jnp.maximum(acc1 * s1_ref[...] + b1_ref[...], 0.0)
        # zero halo rows outside [0, Hout): conv2's 'same' padding along H
        g = row0 - ph + jax.lax.broadcasted_iota(jnp.int32, (THE, 1), 0)
        y1 = jnp.where((g >= 0) & (g < Hout), y1, 0.0).astype(jnp.bfloat16)

        # ---- conv2 + BN + ReLU: intermediate never leaves VMEM --------------
        acc2 = jnp.zeros((TH, LC2), jnp.float32)
        for kh in range(KH):
            acc2 = acc2 + jnp.dot(y1[kh:kh + TH, :], w2_ref[kh],
                                  preferred_element_type=jnp.float32)
        y2 = jnp.maximum(acc2 * s2_ref[...] + b2_ref[...], 0.0)
        o_ref[0] = y2.astype(o_ref.dtype)

    out = pl.pallas_call(
        kernel,
        out_shape=jax.ShapeDtypeStruct((N, Hpad, LC2), jnp.float32),
        grid=(N, Hgrid),
        in_specs=[
            # padded image stays VMEM-resident across the H-tile axis
            pl.BlockSpec((1, Hpp, KC1), lambda n, h: (n, 0, 0)),
            pl.BlockSpec((KH, KC1, LC1), lambda n, h: (0, 0, 0)),
            pl.BlockSpec((KH, LC1, LC2), lambda n, h: (0, 0, 0)),
            pl.BlockSpec((1, LC1), lambda n, h: (0, 0)),
            pl.BlockSpec((1, LC1), lambda n, h: (0, 0)),
            pl.BlockSpec((1, LC2), lambda n, h: (0, 0)),
            pl.BlockSpec((1, LC2), lambda n, h: (0, 0)),
        ],
        out_specs=pl.BlockSpec((1, TH, LC2), lambda n, h: (n, h, 0)),
        compiler_params=pltpu.CompilerParams(
            dimension_semantics=("parallel", "parallel"),
            vmem_limit_bytes=32 * 1024 * 1024,
        ),
    )(xpp, band1, band2, s1r, b1r, s2r, b2r)

    return out[:, :Hout, :W * C2].reshape(N, Hout, W, C2)


# ----------------------------------------------------------------------------
# Deterministic parameter construction (Conv bias + eval-mode BN folded)
# ----------------------------------------------------------------------------
def _init_conv_bn(key, kh, kw, cin, cout):
    k = jax.random.split(key, 6)
    w = jax.random.normal(k[0], (kh, kw, cin, cout), jnp.float32) * (kh * kw * cin) ** -0.5
    b = 0.1 * jax.random.normal(k[1], (cout,), jnp.float32)
    gamma = jax.random.uniform(k[2], (cout,), jnp.float32, minval=0.5, maxval=1.5)
    beta = 0.1 * jax.random.normal(k[3], (cout,), jnp.float32)
    rmean = 0.1 * jax.random.normal(k[4], (cout,), jnp.float32)
    rvar = jax.random.uniform(k[5], (cout,), jnp.float32, minval=0.5, maxval=1.5)
    eps = 1e-5
    scale = gamma / jnp.sqrt(rvar + eps)
    shift = (b - rmean) * scale + beta
    return w, scale, shift


def init_params(key, in_ch, out_ch):
    k1, k2 = jax.random.split(key)
    return {
        "conv1": _init_conv_bn(k1, 3, 3, in_ch, out_ch),
        "conv2": _init_conv_bn(k2, 3, 3, out_ch, out_ch),
    }


# ----------------------------------------------------------------------------
# Pure-JAX reference (mirrors the kernel's bf16 activation/weight quantization)
# ----------------------------------------------------------------------------
def _conv_bn_relu_ref(x, w, scale, shift):
    xb = x.astype(jnp.bfloat16).astype(jnp.float32)
    wb = w.astype(jnp.bfloat16).astype(jnp.float32)
    y = jax.lax.conv_general_dilated(
        xb, wb, window_strides=(1, 1), padding=((1, 1), (1, 1)),
        dimension_numbers=("NHWC", "HWIO", "NHWC"))
    return jnp.maximum(y * scale + shift, 0.0)


def unet_conv2_ref(params, x):
    w, s, b = params["conv1"]
    x = _conv_bn_relu_ref(x, w, s, b)
    w, s, b = params["conv2"]
    x = _conv_bn_relu_ref(x, w, s, b)
    return x


if __name__ == "__main__":
    key = jax.random.PRNGKey(0)
    N, H, W = 2, 16, 16
    in_ch, out_ch = 4, 8

    kx, kp = jax.random.split(key)
    # NHWC input; PyTorch NCHW equivalent is shape (2, 4, 16, 16)
    x = jax.random.normal(kx, (N, H, W, in_ch), jnp.float32)
    params = init_params(kp, in_ch, out_ch)

    fwd = jax.jit(unet_conv2_forward)
    y = jax.block_until_ready(fwd(params, x))
    assert y.shape == (N, H, W, out_ch), y.shape

    # numerical sanity check against XLA conv (same bf16 quantization)
    y_ref = jax.block_until_ready(unet_conv2_ref(params, x))
    err = float(jnp.max(jnp.abs(y - y_ref)))
    assert err < 0.1, f"max abs err {err}"

    print("KERNEL_OK")
</pallas_src>

<mosaic_0001>
module attributes {stable_mosaic.version = 11 : i64} {
  func.func @kernel(%arg0: i32, %arg1: i32, %arg2: memref<1x20x128xbf16, #tpu.memory_space<vmem>>, %arg3: memref<3x128x128xbf16, #tpu.memory_space<vmem>>, %arg4: memref<3x128x128xbf16, #tpu.memory_space<vmem>>, %arg5: memref<1x128xf32, #tpu.memory_space<vmem>>, %arg6: memref<1x128xf32, #tpu.memory_space<vmem>>, %arg7: memref<1x128xf32, #tpu.memory_space<vmem>>, %arg8: memref<1x128xf32, #tpu.memory_space<vmem>>, %arg9: memref<1x16x128xf32, #tpu.memory_space<vmem>>) attributes {dimension_semantics = [#tpu.dimension_semantics<parallel>, #tpu.dimension_semantics<parallel>], iteration_bounds = array<i64: 2, 1>, scalar_prefetch = 0 : i64, scratch_operands = 0 : i64, tpu.core_type = #tpu.core_type<tc>, window_params = [{transform_indices = @transform_0, window_bounds = array<i64: 1, 20, 128>}, {pipeline_mode = #tpu.pipeline_mode<synchronous>, transform_indices = @transform_1, window_bounds = array<i64: 3, 128, 128>}, {pipeline_mode = #tpu.pipeline_mode<synchronous>, transform_indices = @transform_2, window_bounds = array<i64: 3, 128, 128>}, {pipeline_mode = #tpu.pipeline_mode<synchronous>, transform_indices = @transform_3, window_bounds = array<i64: 1, 128>}, {pipeline_mode = #tpu.pipeline_mode<synchronous>, transform_indices = @transform_4, window_bounds = array<i64: 1, 128>}, {pipeline_mode = #tpu.pipeline_mode<synchronous>, transform_indices = @transform_5, window_bounds = array<i64: 1, 128>}, {pipeline_mode = #tpu.pipeline_mode<synchronous>, transform_indices = @transform_6, window_bounds = array<i64: 1, 128>}, {transform_indices = @transform_7, window_bounds = array<i64: 1, 16, 128>}]} {
    %c16_i32 = arith.constant 16 : i32
    %0 = arith.muli %arg1, %c16_i32 : i32
    %1 = tpu.assume_multiple %0, 16 : i32
    %c0 = arith.constant 0 : index
    %2 = arith.index_cast %1 : i32 to index
    %c0_0 = arith.constant 0 : index
    %3 = vector.load %arg2[%c0, %2, %c0_0] : memref<1x20x128xbf16, #tpu.memory_space<vmem>>, vector<1x20x128xbf16>
    %4 = vector.shape_cast %3 : vector<1x20x128xbf16> to vector<20x128xbf16>
    %cst = arith.constant 0.000000e+00 : f32
    %5 = vector.broadcast %cst : f32 to vector<18x128xf32>
    %6 = vector.extract_strided_slice %4 {offsets = [0, 0], sizes = [18, 128], strides = [1, 1]} : vector<20x128xbf16> to vector<18x128xbf16>
    %c0_1 = arith.constant 0 : index
    %c0_2 = arith.constant 0 : index
    %c0_3 = arith.constant 0 : index
    %7 = vector.load %arg3[%c0_1, %c0_2, %c0_3] : memref<3x128x128xbf16, #tpu.memory_space<vmem>>, vector<1x128x128xbf16>
    %8 = vector.shape_cast %7 : vector<1x128x128xbf16> to vector<128x128xbf16>
    %cst_4 = arith.constant dense<0.000000e+00> : vector<18x128xf32>
    %9 = tpu.matmul %6, %8, %cst_4 {dimension_numbers = #tpu.dot_dimension_numbers<[1], [0], [0], [1], [0, 0, 1, 1], [], []>} : vector<18x128xbf16>, vector<128x128xbf16>, vector<18x128xf32> -> vector<18x128xf32>
    %10 = arith.addf %5, %9 : vector<18x128xf32>
    %11 = vector.extract_strided_slice %4 {offsets = [1, 0], sizes = [18, 128], strides = [1, 1]} : vector<20x128xbf16> to vector<18x128xbf16>
    %c1 = arith.constant 1 : index
    %c0_5 = arith.constant 0 : index
    %c0_6 = arith.constant 0 : index
    %12 = vector.load %arg3[%c1, %c0_5, %c0_6] : memref<3x128x128xbf16, #tpu.memory_space<vmem>>, vector<1x128x128xbf16>
    %13 = vector.shape_cast %12 : vector<1x128x128xbf16> to vector<128x128xbf16>
    %cst_7 = arith.constant dense<0.000000e+00> : vector<18x128xf32>
    %14 = tpu.matmul %11, %13, %cst_7 {dimension_numbers = #tpu.dot_dimension_numbers<[1], [0], [0], [1], [0, 0, 1, 1], [], []>} : vector<18x128xbf16>, vector<128x128xbf16>, vector<18x128xf32> -> vector<18x128xf32>
    %15 = arith.addf %10, %14 : vector<18x128xf32>
    %16 = vector.extract_strided_slice %4 {offsets = [2, 0], sizes = [18, 128], strides = [1, 1]} : vector<20x128xbf16> to vector<18x128xbf16>
    %c2 = arith.constant 2 : index
    %c0_8 = arith.constant 0 : index
    %c0_9 = arith.constant 0 : index
    %17 = vector.load %arg3[%c2, %c0_8, %c0_9] : memref<3x128x128xbf16, #tpu.memory_space<vmem>>, vector<1x128x128xbf16>
    %18 = vector.shape_cast %17 : vector<1x128x128xbf16> to vector<128x128xbf16>
    %cst_10 = arith.constant dense<0.000000e+00> : vector<18x128xf32>
    %19 = tpu.matmul %16, %18, %cst_10 {dimension_numbers = #tpu.dot_dimension_numbers<[1], [0], [0], [1], [0, 0, 1, 1], [], []>} : vector<18x128xbf16>, vector<128x128xbf16>, vector<18x128xf32> -> vector<18x128xf32>
    %20 = arith.addf %15, %19 : vector<18x128xf32>
    %c0_11 = arith.constant 0 : index
    %c0_12 = arith.constant 0 : index
    %21 = vector.load %arg5[%c0_11, %c0_12] : memref<1x128xf32, #tpu.memory_space<vmem>>, vector<1x128xf32>
    %22 = vector.broadcast %21 : vector<1x128xf32> to vector<18x128xf32>
    %23 = arith.mulf %20, %22 : vector<18x128xf32>
    %c0_13 = arith.constant 0 : index
    %c0_14 = arith.constant 0 : index
    %24 = vector.load %arg6[%c0_13, %c0_14] : memref<1x128xf32, #tpu.memory_space<vmem>>, vector<1x128xf32>
    %25 = vector.broadcast %24 : vector<1x128xf32> to vector<18x128xf32>
    %26 = arith.addf %23, %25 : vector<18x128xf32>
    %cst_15 = arith.constant 0.000000e+00 : f32
    %27 = vector.broadcast %cst_15 : f32 to vector<18x128xf32>
    %28 = arith.maximumf %26, %27 : vector<18x128xf32>
    %c1_i32 = arith.constant 1 : i32
    %29 = arith.subi %1, %c1_i32 : i32
    %30 = tpu.iota {dimensions = array<i32: 0>} : vector<18x1xi32>
    %31 = vector.broadcast %29 : i32 to vector<18x1xi32>
    %32 = arith.addi %31, %30 : vector<18x1xi32>
    %c0_i32 = arith.constant 0 : i32
    %33 = vector.broadcast %c0_i32 : i32 to vector<18x1xi32>
    %34 = arith.cmpi sge, %32, %33 : vector<18x1xi32>
    %c16_i32_16 = arith.constant 16 : i32
    %35 = vector.broadcast %c16_i32_16 : i32 to vector<18x1xi32>
    %36 = arith.cmpi slt, %32, %35 : vector<18x1xi32>
    %37 = arith.andi %34, %36 : vector<18x1xi1>
    %cst_17 = arith.constant 0.000000e+00 : f32
    %38 = vector.shape_cast %37 : vector<18x1xi1> to vector<18x1xi1>
    %39 = vector.broadcast %38 : vector<18x1xi1> to vector<18x128xi1>
    %40 = vector.broadcast %cst_17 : f32 to vector<18x128xf32>
    %41 = arith.select %39, %28, %40 : vector<18x128xi1>, vector<18x128xf32>
    %42 = arith.truncf %41 : vector<18x128xf32> to vector<18x128xbf16>
    %cst_18 = arith.constant 0.000000e+00 : f32
    %43 = vector.broadcast %cst_18 : f32 to vector<16x128xf32>
    %44 = vector.extract_strided_slice %42 {offsets = [0, 0], sizes = [16, 128], strides = [1, 1]} : vector<18x128xbf16> to vector<16x128xbf16>
    %c0_19 = arith.constant 0 : index
    %c0_20 = arith.constant 0 : index
    %c0_21 = arith.constant 0 : index
    %45 = vector.load %arg4[%c0_19, %c0_20, %c0_21] : memref<3x128x128xbf16, #tpu.memory_space<vmem>>, vector<1x128x128xbf16>
    %46 = vector.shape_cast %45 : vector<1x128x128xbf16> to vector<128x128xbf16>
    %cst_22 = arith.constant dense<0.000000e+00> : vector<16x128xf32>
    %47 = tpu.matmul %44, %46, %cst_22 {dimension_numbers = #tpu.dot_dimension_numbers<[1], [0], [0], [1], [0, 0, 1, 1], [], []>} : vector<16x128xbf16>, vector<128x128xbf16>, vector<16x128xf32> -> vector<16x128xf32>
    %48 = arith.addf %43, %47 : vector<16x128xf32>
    %49 = vector.extract_strided_slice %42 {offsets = [1, 0], sizes = [16, 128], strides = [1, 1]} : vector<18x128xbf16> to vector<16x128xbf16>
    %c1_23 = arith.constant 1 : index
    %c0_24 = arith.constant 0 : index
    %c0_25 = arith.constant 0 : index
    %50 = vector.load %arg4[%c1_23, %c0_24, %c0_25] : memref<3x128x128xbf16, #tpu.memory_space<vmem>>, vector<1x128x128xbf16>
    %51 = vector.shape_cast %50 : vector<1x128x128xbf16> to vector<128x128xbf16>
    %cst_26 = arith.constant dense<0.000000e+00> : vector<16x128xf32>
    %52 = tpu.matmul %49, %51, %cst_26 {dimension_numbers = #tpu.dot_dimension_numbers<[1], [0], [0], [1], [0, 0, 1, 1], [], []>} : vector<16x128xbf16>, vector<128x128xbf16>, vector<16x128xf32> -> vector<16x128xf32>
    %53 = arith.addf %48, %52 : vector<16x128xf32>
    %54 = vector.extract_strided_slice %42 {offsets = [2, 0], sizes = [16, 128], strides = [1, 1]} : vector<18x128xbf16> to vector<16x128xbf16>
    %c2_27 = arith.constant 2 : index
    %c0_28 = arith.constant 0 : index
    %c0_29 = arith.constant 0 : index
    %55 = vector.load %arg4[%c2_27, %c0_28, %c0_29] : memref<3x128x128xbf16, #tpu.memory_space<vmem>>, vector<1x128x128xbf16>
    %56 = vector.shape_cast %55 : vector<1x128x128xbf16> to vector<128x128xbf16>
    %cst_30 = arith.constant dense<0.000000e+00> : vector<16x128xf32>
    %57 = tpu.matmul %54, %56, %cst_30 {dimension_numbers = #tpu.dot_dimension_numbers<[1], [0], [0], [1], [0, 0, 1, 1], [], []>} : vector<16x128xbf16>, vector<128x128xbf16>, vector<16x128xf32> -> vector<16x128xf32>
    %58 = arith.addf %53, %57 : vector<16x128xf32>
    %c0_31 = arith.constant 0 : index
    %c0_32 = arith.constant 0 : index
    %59 = vector.load %arg7[%c0_31, %c0_32] : memref<1x128xf32, #tpu.memory_space<vmem>>, vector<1x128xf32>
    %60 = vector.broadcast %59 : vector<1x128xf32> to vector<16x128xf32>
    %61 = arith.mulf %58, %60 : vector<16x128xf32>
    %c0_33 = arith.constant 0 : index
    %c0_34 = arith.constant 0 : index
    %62 = vector.load %arg8[%c0_33, %c0_34] : memref<1x128xf32, #tpu.memory_space<vmem>>, vector<1x128xf32>
    %63 = vector.broadcast %62 : vector<1x128xf32> to vector<16x128xf32>
    %64 = arith.addf %61, %63 : vector<16x128xf32>
    %cst_35 = arith.constant 0.000000e+00 : f32
    %65 = vector.broadcast %cst_35 : f32 to vector<16x128xf32>
    %66 = arith.maximumf %64, %65 : vector<16x128xf32>
    %c0_36 = arith.constant 0 : index
    %c0_37 = arith.constant 0 : index
    %c0_38 = arith.constant 0 : index
    %67 = vector.load %arg9[%c0_36, %c0_37, %c0_38] : memref<1x16x128xf32, #tpu.memory_space<vmem>>, vector<1x16x128xf32>
    %68 = vector.shape_cast %67 : vector<1x16x128xf32> to vector<16x128xf32>
    %69 = vector.shape_cast %66 : vector<16x128xf32> to vector<1x16x128xf32>
    tpu.vector_store %arg9[%c0_36, %c0_37, %c0_38], %69 {strides = array<i32>} : memref<1x16x128xf32, #tpu.memory_space<vmem>>, vector<1x16x128xf32>,
    return
  }
  func.func @transform_0(%arg0: i32, %arg1: i32) -> (i32, i32, i32) {
    %c0_i32 = arith.constant 0 : i32
    %c0_i32_0 = arith.constant 0 : i32
    %c0_i32_1 = arith.constant 0 : i32
    return %arg0, %c0_i32, %c0_i32_0 : i32, i32, i32
  }
  func.func @transform_1(%arg0: i32, %arg1: i32) -> (i32, i32, i32) {
    %c0_i32 = arith.constant 0 : i32
    %c0_i32_0 = arith.constant 0 : i32
    %c0_i32_1 = arith.constant 0 : i32
    %c0_i32_2 = arith.constant 0 : i32
    return %c0_i32, %c0_i32_0, %c0_i32_1 : i32, i32, i32
  }
  func.func @transform_2(%arg0: i32, %arg1: i32) -> (i32, i32, i32) {
    %c0_i32 = arith.constant 0 : i32
    %c0_i32_0 = arith.constant 0 : i32
    %c0_i32_1 = arith.constant 0 : i32
    %c0_i32_2 = arith.constant 0 : i32
    return %c0_i32, %c0_i32_0, %c0_i32_1 : i32, i32, i32
  }
  func.func @transform_3(%arg0: i32, %arg1: i32) -> (i32, i32) {
    %c0_i32 = arith.constant 0 : i32
    %c0_i32_0 = arith.constant 0 : i32
    %c0_i32_1 = arith.constant 0 : i32
    return %c0_i32, %c0_i32_0 : i32, i32
  }
  func.func @transform_4(%arg0: i32, %arg1: i32) -> (i32, i32) {
    %c0_i32 = arith.constant 0 : i32
    %c0_i32_0 = arith.constant 0 : i32
    %c0_i32_1 = arith.constant 0 : i32
    return %c0_i32, %c0_i32_0 : i32, i32
  }
  func.func @transform_5(%arg0: i32, %arg1: i32) -> (i32, i32) {
    %c0_i32 = arith.constant 0 : i32
    %c0_i32_0 = arith.constant 0 : i32
    %c0_i32_1 = arith.constant 0 : i32
    return %c0_i32, %c0_i32_0 : i32, i32
  }
  func.func @transform_6(%arg0: i32, %arg1: i32) -> (i32, i32) {
    %c0_i32 = arith.constant 0 : i32
    %c0_i32_0 = arith.constant 0 : i32
    %c0_i32_1 = arith.constant 0 : i32
    return %c0_i32, %c0_i32_0 : i32, i32
  }
  func.func @transform_7(%arg0: i32, %arg1: i32) -> (i32, i32, i32) {
    %c0_i32 = arith.constant 0 : i32
    %c0_i32_0 = arith.constant 0 : i32
    return %arg0, %arg1, %c0_i32 : i32, i32, i32
  }
}

</mosaic_0001>

<bundles_post_ra>
// kernel: tile.23
= control target key start
LH: loop header
LB: loop body
LE: loop exit
PB: predicated region body
PF: predicated region fallthrough
CT: control target
= control target key end

     0   :  { %s28_s0 = inlined_call_operand.vmem [shape: f32[8], index: 0, kind: input, shape index: {}]   ;;  %s29_s1 = inlined_call_operand.vmem [shape: f32[16,8], index: 1, kind: output, shape index: {}]  }
   0x1   :  { %v4_v0 = vld [vmem:[%s28_s0] ss:$0 sm:$0xff] }
   0x2   :  { %5 = vst [vmem:[%s29_s1] sm:$0xff] %v4_v0  ;;  %8 = vst [vmem:[%s29_s1 + $0x8] sm:$0xff] %v4_v0 }

// kernel: unet_conv2_forward.1
= control target key start
LH: loop header
LB: loop body
LE: loop exit
PB: predicated region body
PF: predicated region fallthrough
CT: control target
= control target key end

     0   :  { %s1651_s24 = smov 0   ;;  %s1653_s25 = smov 0   ;;  %s1892_s0 = inlined_call_operand.vmem [shape: bf16[2,20,128], index: 0, kind: input, shape index: {}]   ;;  %s1893_s1 = inlined_call_operand.vmem [shape: bf16[3,128,128], index: 1, kind: input, shape index: {}]   ;;  %s1894_s2 = inlined_call_operand.vmem [shape: bf16[3,128,128], index: 2, kind: input, shape index: {}]   ;;  %s1895_s3 = inlined_call_operand.vmem [shape: f32[1,128], index: 3, kind: input, shape index: {}]   ;;  %s1896_s4 = inlined_call_operand.vmem [shape: f32[1,128], index: 4, kind: input, shape index: {}]   ;;  %s1897_s5 = inlined_call_operand.vmem [shape: f32[1,128], index: 5, kind: input, shape index: {}]   ;;  %s1898_s6 = inlined_call_operand.vmem [shape: f32[1,128], index: 6, kind: input, shape index: {}]   ;;  %s1899_s7 = inlined_call_operand.vmem [shape: f32[2,16,128], index: 7, kind: output, shape index: {}]  }
   0x1   :  { %s1655_s26 = smov 0  }
   0x2 LB: > { %s29_s27 = sadd.s32 1, %s1602_s25  ;;  %p1185_p0 = scmp.ge.s32.totalorder %s1606_s26, 1  ;;  %s1606_s26 = sphi %s1655_s26, %s17_s26   ;;  %s1602_s25 = sphi %s1653_s25, %s1901_s25   ;;  %s1598_s24 = sphi %s1651_s24, %s1900_s24  }
   0x3   : > { %p31_p1 = scmp.ge.s32.totalorder %s29_s27, 2  ;;  %p251_p2 = scmp.lt.s32.totalorder %s1606_s26, 3 }
   0x5   : > { %s1903_s27 = smov (%p31_p1, %s29_s27), 0  ;;  %p252_p3 = pnand %p1185_p0, %p251_p2 }
   0x6   : > { %v1534_v0 = vld [vmem:[%s1893_s1 + $0x40] sm:$0xff] (!%p252_p3)   ;;  %p287_p4 = scmp.lt.s32.totalorder (!%p252_p3), %s1598_s24, 1  ;;  %v1535_v1 = vld [vmem:[%s1893_s1 + $0x48] sm:$0xff] (!%p252_p3)   ;;  %v1536_v2 = vld [vmem:[%s1893_s1 + $0x50] sm:$0xff] (!%p252_p3)   ;;  %v1608_v3 = vmov (!%p252_p3), 0.0   ;;  %vm581_vm1 = vcmask (!%p252_p3), 1046528   ;;  %v710_v47 = vlaneseq (!%p252_p3) }
   0x7   : > { %255 = sbr.rel (%p252_p3) target bundleno = 618 (0x26a), region = 48  ;;  %1370 = vmatprep.subr.bf16.mxu0 (!%p252_p3), %v1534_v0  ;;  %1430 = vmatprep.subr.bf16.mxu1 (!%p252_p3), %v1608_v3  ;;  %v1537_v4 = vld [vmem:[%s1893_s1 + $0x58] sm:$0xff] (!%p252_p3)   ;;  %v1538_v10 = vld [vmem:[%s1893_s1 + $0x60] sm:$0xff] (!%p252_p3)   ;;  %vm352_vm0 = vsmask.f32 (!%p252_p3), 7424  ;;  %v1539_v14 = vld [vmem:[%s1893_s1 + $0x68] sm:$0xff] (!%p252_p3)  }
   0x8   : > { %1371 = vmatpush3.bf16.msra.mxu0 (!%p252_p3), %v1534_v0  ;;  %v1540_v16 = vld [vmem:[%s1893_s1 + $0x70] sm:$0xff] (!%p252_p3)   ;;  %v1541_v17 = vld [vmem:[%s1893_s1 + $0x78] sm:$0xff] (!%p252_p3)   ;;  %v1560_v19 = vld [vmem:[%s1894_s2 + $0x40] sm:$0xff] (!%p252_p3)   ;;  %vm1609_vm2 = vmmov (!%p252_p3), 0   ;;  %v711_v48 = vshrl.u32 (!%p252_p3), %v710_v47, 7  ;;  %vm1610_vm5 = vmmov (!%p252_p3), 1  }
   0x9   : > { %1372 = vmatprep.subr.bf16.mxu0 (!%p252_p3), %v1535_v1  ;;  %v1544_v20 = vld [vmem:[%s1893_s1] sm:$0xff] (!%p252_p3)   ;;  %1431 = vmatpush3.bf16.msra.mxu1 (!%p252_p3), %v1560_v19  ;;  %v1561_v21 = vld [vmem:[%s1894_s2 + $0x48] sm:$0xff] (!%p252_p3)   ;;  %v1562_v24 = vld [vmem:[%s1894_s2 + $0x50] sm:$0xff] (!%p252_p3)  }
   0xa   : > { %v1545_v23 = vld [vmem:[%s1893_s1 + $0x8] sm:$0xff] (!%p252_p3)   ;;  %1432 = vmatprep.subr.bf16.mxu1 (!%p252_p3), %v1608_v3  ;;  %v1546_v25 = vld [vmem:[%s1893_s1 + $0x10] sm:$0xff] (!%p252_p3)   ;;  %v1563_v26 = vld [vmem:[%s1894_s2 + $0x58] sm:$0xff] (!%p252_p3)   ;;  %1446 = vmatprep.mubr.msk.bf16.mxu1 (!%p252_p3), %vm1609_vm2, %v1608_v3  ;;  %v713_v49 = vadd.s32 (!%p252_p3), 16, %v711_v48  ;;  %v715_v56 = vadd.s32 (!%p252_p3), 4294967295, %v711_v48 }
   0xb   : > { %v1547_v27 = vld [vmem:[%s1893_s1 + $0x18] sm:$0xff] (!%p252_p3)   ;;  %v1548_v28 = vld [vmem:[%s1893_s1 + $0x20] sm:$0xff] (!%p252_p3)   ;;  %v1549_v29 = vld [vmem:[%s1893_s1 + $0x28] sm:$0xff] (!%p252_p3)  }
   0xc   : > { %1373 = vmatpush3.bf16.msra.mxu0 (!%p252_p3), %v1535_v1  ;;  %v1550_v30 = vld [vmem:[%s1893_s1 + $0x30] sm:$0xff] (!%p252_p3)   ;;  %v1551_v31 = vld [vmem:[%s1893_s1 + $0x38] sm:$0xff] (!%p252_p3)   ;;  %v1552_v32 = vld [vmem:[%s1893_s1 + $0x80] sm:$0xff] (!%p252_p3)   ;;  %v717_v53 = vadd.s32 (!%p252_p3), 4294967295, %v713_v49  ;;  %vm718_vm4 = vcmp.ge.s32.totalorder (!%p252_p3), %v715_v56, 0 }
   0xd   : > { %1374 = vmatprep.subr.bf16.mxu0 (!%p252_p3), %v1536_v2  ;;  %1433 = vmatpush3.bf16.msra.mxu1 (!%p252_p3), %v1561_v21  ;;  %v1553_v35 = vld [vmem:[%s1893_s1 + $0x88] sm:$0xff] (!%p252_p3)   ;;  %v1554_v37 = vld [vmem:[%s1893_s1 + $0x90] sm:$0xff] (!%p252_p3)   ;;  %v1555_v38 = vld [vmem:[%s1893_s1 + $0x98] sm:$0xff] (!%p252_p3)  }
   0xe   : > { %s1905_s24 = smov (!%p287_p4, %s1598_s24), 1  ;;  %1434 = vmatprep.subr.bf16.mxu1 %v1608_v3  ;;  %v1556_v39 = vld [vmem:[%s1893_s1 + $0xa0] sm:$0xff]   ;;  %v1557_v40 = vld [vmem:[%s1893_s1 + $0xa8] sm:$0xff]   ;;  %v1558_v41 = vld [vmem:[%s1893_s1 + $0xb0] sm:$0xff]   ;;  %vm723_vm3 = vcmp.lt.s32.totalorder %v717_v53, 16 }
   0xf   : > { %s1506_s11 = smul.u32 12, %s1905_s24  ;;  %v1559_v42 = vld [vmem:[%s1893_s1 + $0xb8] sm:$0xff]   ;;  %v1564_v43 = vld [vmem:[%s1894_s2 + $0x60] sm:$0xff]   ;;  %v1565_v44 = vld [vmem:[%s1894_s2 + $0x68] sm:$0xff]   ;;  %s1312_s18 = sshll.u32 %s1905_s24, 4 }
  0x10   : > { %1375 = vmatpush3.bf16.msra.mxu0 %v1536_v2  ;;  %v1566_v45 = vld [vmem:[%s1894_s2 + $0x70] sm:$0xff]   ;;  %v1567_v46 = vld [vmem:[%s1894_s2 + $0x78] sm:$0xff]   ;;  %v1247_v50 = vld [vmem:[%s1895_s3] ss:$0 sm:$0xff]  ;;  %s300_s21 = scalar_lea.vmem %s1899_s7, %s1312_s18 }
  0x11   : > { %s291_s14 = scalar_lea.vmem %s1892_s0, %s1506_s11  ;;  %1376 = vmatprep.subr.bf16.mxu0 %v1537_v4  ;;  %1435 = vmatpush3.bf16.msra.mxu1 %v1562_v24  ;;  %v1248_v52 = vld [vmem:[%s1896_s4] ss:$0 sm:$0xff]  ;;  %v1570_v21 = vld [vmem:[%s1894_s2 + $0x10] sm:$0xff]   ;;  %v1573_v24 = vld [vmem:[%s1894_s2 + $0x28] sm:$0xff]  }
  0x12   : > { %v1688_v5 = vld [vmem:[%s291_s14] sm:$0xff]   ;;  %v1690_v6 = vld [vmem:[%s291_s14 + $0x8] ss:$0 sps:$4 sm:$0x33]   ;;  %1436 = vmatprep.subr.bf16.mxu1 %v1608_v3  ;;  %vm1281_vm6 = vmpackc.low %vm1610_vm5, %vm718_vm4 }
  0x13   : > { %v354_v7 = vshrl.u32 %v1688_v5, 16  ;;  %v356_v8 = vshll.u32 %v1688_v5, 16  ;;  %v361_v9 = vshll.u32 %v1690_v6, 16  ;;  %v365_v18 = vshrl.u32 %v1690_v6, 16 }
  0x14   : > { %1377 = vmatpush3.bf16.msra.mxu0 %v1537_v4  ;;  %v582_v33 = vrot.slane %v1688_v5, 1  ;;  %v583_v34 = vrot.slane %v1690_v6, 1 }
  0x15   : > { %v358_v11 = vrot.slane %v356_v8, 1  ;;  %v363_v12 = vrot.slane %v361_v9, 1  ;;  %1378 = vmatprep.subr.bf16.mxu0 %v1538_v10  ;;  %1437 = vmatpush3.bf16.msra.mxu1 %v1563_v26  ;;  %v1575_v26 = vld [vmem:[%s1894_s2 + $0x38] sm:$0xff]  }
  0x16   : > { %1438 = vmatprep.subr.bf16.mxu1 %v1608_v3  ;;  %v584_v36 = vsel %vm581_vm1, %v582_v33, %v583_v34  ;;  %v1582_v33 = vld [vmem:[%s1894_s2 + $0xb0] sm:$0xff]  }
  0x17   : > { %v359_v13 = vor.u32 %v358_v11, %v354_v7  ;;  %v367_v22 = vor.u32 %v365_v18, %v363_v12  ;;  %v1568_v18 = vld [vmem:[%s1894_s2] sm:$0xff]  }
  0x18   : > { %1379 = vmatpush3.bf16.msra.mxu0 %v1538_v10 }
  0x19   : > { %v364_v15 = vsel %vm352_vm0, %v359_v13, %v363_v12  ;;  %1380 = vmatprep.subr.bf16.mxu0 %v1539_v14  ;;  %1439 = vmatpush3.bf16.msra.mxu1 %v1564_v43 }
  0x1a   : > { %1386 = vmatprep.mubr.bf16.mxu0 %v364_v15  ;;  %1440 = vmatprep.subr.bf16.mxu1 %v1608_v3 }
  0x1c   : > { %1381 = vmatpush3.bf16.msra.mxu0 %v1539_v14 }
  0x1d   : > { %1382 = vmatprep.subr.bf16.mxu0 %v1540_v16  ;;  %1441 = vmatpush3.bf16.msra.mxu1 %v1565_v44 }
  0x1e   : > { %1442 = vmatprep.subr.bf16.mxu1 %v1608_v3 }
  0x20   : > { %1383 = vmatpush3.bf16.msra.mxu0 %v1540_v16 }
  0x21   : > { %1384 = vmatprep.subr.bf16.mxu0 %v1541_v17  ;;  %1443 = vmatpush3.bf16.msra.mxu1 %v1566_v45 }
  0x22   : > { %1444 = vmatprep.subr.bf16.mxu1 %v1608_v3 }
  0x24   : > { %1385 = vmatpush3.bf16.msra.mxu0 %v1541_v17 }
  0x25   : > { %1390 = vmatprep.subr.bf16.mxu0 %v1544_v20  ;;  %1445 = vmatpush3.bf16.msra.mxu1 %v1567_v46 }
  0x26   : > { %1450 = vmatprep.subr.bf16.mxu1 %v1608_v3 }
  0x27   : > { %1387 = vmatmul.mubr.bf16.vlgmr.msra.gmra.mrb[0].mxu0 %v367_v22  ;;  %v1571_v22 = vld [vmem:[%s1894_s2 + $0x18] sm:$0xff]  }
  0x28   : > { %1391 = vmatpush3.bf16.msra.mxu0 %v1544_v20  ;;  %1406 = vmatprep.mubr.bf16.mxu0 %v1688_v5  ;;  %v1569_v20 = vld [vmem:[%s1894_s2 + $0x8] sm:$0xff]  }
  0x29   : > { %1392 = vmatprep.subr.bf16.mxu0 %v1545_v23 }
  0x2c   : > { %1393 = vmatpush3.bf16.msra.mxu0 %v1545_v23  ;;  %v1572_v23 = vld [vmem:[%s1894_s2 + $0x20] sm:$0xff]  }
  0x2d   : > { %1394 = vmatprep.subr.bf16.mxu0 %v1546_v25 }
  0x30   : > { %1395 = vmatpush3.bf16.msra.mxu0 %v1546_v25  ;;  %v1574_v25 = vld [vmem:[%s1894_s2 + $0x30] sm:$0xff]  }
  0x31   : > { %1396 = vmatprep.subr.bf16.mxu0 %v1547_v27 }
  0x34   : > { %1397 = vmatpush3.bf16.msra.mxu0 %v1547_v27  ;;  %v1576_v27 = vld [vmem:[%s1894_s2 + $0x80] sm:$0xff]  }
  0x35   : > { %1398 = vmatprep.subr.bf16.mxu0 %v1548_v28 }
  0x38   : > { %1399 = vmatpush3.bf16.msra.mxu0 %v1548_v28  ;;  %v1577_v28 = vld [vmem:[%s1894_s2 + $0x88] sm:$0xff]  }
  0x39   : > { %1400 = vmatprep.subr.bf16.mxu0 %v1549_v29 }
  0x3c   : > { %1401 = vmatpush3.bf16.msra.mxu0 %v1549_v29  ;;  %v1578_v29 = vld [vmem:[%s1894_s2 + $0x90] sm:$0xff]  }
  0x3d   : > { %1402 = vmatprep.subr.bf16.mxu0 %v1550_v30 }
  0x40   : > { %1403 = vmatpush3.bf16.msra.mxu0 %v1550_v30  ;;  %v1579_v30 = vld [vmem:[%s1894_s2 + $0x98] sm:$0xff]  }
  0x41   : > { %1404 = vmatprep.subr.bf16.mxu0 %v1551_v31 }
  0x44   : > { %1405 = vmatpush3.bf16.msra.mxu0 %v1551_v31  ;;  %v1580_v31 = vld [vmem:[%s1894_s2 + $0xa0] sm:$0xff]  }
  0x45   : > { %1410 = vmatprep.subr.bf16.mxu0 %v1552_v32 }
  0x47   : > { %1407 = vmatmul.mubr.bf16.vlgmr.msra.gmra.mrb[0].mxu0 %v1690_v6 }
  0x48   : > { %1411 = vmatpush3.bf16.msra.mxu0 %v1552_v32  ;;  %1426 = vmatprep.mubr.bf16.mxu0 %v584_v36  ;;  %v1581_v32 = vld [vmem:[%s1894_s2 + $0xa8] sm:$0xff]  }
  0x49   : > { %1412 = vmatprep.subr.bf16.mxu0 %v1553_v35 }
  0x4c   : > { %1413 = vmatpush3.bf16.msra.mxu0 %v1553_v35  ;;  %v1308_v35 = vld [vmem:[%s1897_s5] ss:$0 sm:$0xff] }
  0x4d   : > { %1414 = vmatprep.subr.bf16.mxu0 %v1554_v37 }
  0x50   : > { %1415 = vmatpush3.bf16.msra.mxu0 %v1554_v37  ;;  %v1309_v37 = vld [vmem:[%s1898_s6] ss:$0 sm:$0xff] }
  0x51   : > { %1416 = vmatprep.subr.bf16.mxu0 %v1555_v38 }
  0x54   : > { %1417 = vmatpush3.bf16.msra.mxu0 %v1555_v38 }
  0x55   : > { %1418 = vmatprep.subr.bf16.mxu0 %v1556_v39 }
  0x58   : > { %1419 = vmatpush3.bf16.msra.mxu0 %v1556_v39 }
  0x59   : > { %1420 = vmatprep.subr.bf16.mxu0 %v1557_v40 }
  0x5c   : > { %1421 = vmatpush3.bf16.msra.mxu0 %v1557_v40 }
  0x5d   : > { %1422 = vmatprep.subr.bf16.mxu0 %v1558_v41 }
  0x60   : > { %1423 = vmatpush3.bf16.msra.mxu0 %v1558_v41 }
  0x61   : > { %1424 = vmatprep.subr.bf16.mxu0 %v1559_v42 }
  0x64   : > { %1425 = vmatpush3.bf16.msra.mxu0 %v1559_v42 }
  0x67   : > { %1427 = vmatmul.mubr.bf16.vlgmr.msra.gmra.mrb[0].mxu0 %v583_v34  ;;  %v1583_v34 = vld [vmem:[%s1894_s2 + $0xb8] sm:$0xff]  }
 0x13a   : > { %v1428_v51 = vpop.f32.mrb[0].mxu0 }
 0x13b   : > { %v695_v54 = vmul.f32 %v1428_v51, %v1247_v50  ;;  %v669_v55 = vpop.f32.mrb[1].mxu0 }
 0x13c   : > { %v693_v57 = vmul.f32 %v1247_v50, %v669_v55  ;;  %v1429_v58 = vpop.f32.mrb[2].mxu0 }
 0x13d   : > { %v705_v59 = vadd.f32 %v1248_v52, %v695_v54  ;;  %v672_v60 = vpop.f32.mrb[3].mxu0 }
 0x13e   : > { %v703_v61 = vadd.f32 %v1248_v52, %v693_v57  ;;  %v694_v62 = vmul.f32 %v1247_v50, %v672_v60 }
 0x13f   : > { %v708_v63 = vmax.f32 %v705_v59, 0.0 }
 0x140   : > { %v706_v0 = vmax.f32 %v703_v61, 0.0  ;;  %v704_v1 = vadd.f32 %v1248_v52, %v694_v62 }
 0x141   : > { %v735_v2 = vsel %vm723_vm3, %v708_v63, 0.0 }
 0x142   : > { %v737_v4 = vpack.c.bf16 %v735_v2, %v735_v2  ;;  %v733_v5 = vsel %vm718_vm4, %v706_v0, 0.0  ;;  %v707_v6 = vmax.f32 %v704_v1, 0.0 }
 0x144   : > { %v736_v7 = vpack.c.bf16 %v707_v6, %v733_v5  ;;  %v1282_v8 = vpack.c.bf16 %v707_v6, %v706_v0  ;;  %v982_v9 = vrot.slane %v737_v4, 1  ;;  %v779_v11 = vshll.u32 %v737_v4, 16 }
 0x146   : > { %v774_v10 = vshll.u32 %v736_v7, 16  ;;  %v981_v12 = vrot.slane %v736_v7, 1  ;;  %v772_v13 = vshrl.u32 %v736_v7, 16  ;;  %v781_v17 = vrot.slane %v779_v11, 1 }
 0x148   : > { %v776_v14 = vrot.slane %v774_v10, 1  ;;  %v983_v15 = vsel %vm581_vm1, %v981_v12, %v982_v9 }
 0x14a   : > { %v777_v16 = vor.u32 %v776_v14, %v772_v13 }
 0x14c   : > { %v782_v19 = vsel %vm352_vm0, %v777_v16, %v781_v17 }
 0x14d   : > { %1447 = vmatmul.mubr.bf16.vlgmr.msra.gmra.mrb[0].mxu1 %v782_v19 }
 0x14e   : > { %1451 = vmatpush3.bf16.msra.mxu1 %v1568_v18  ;;  %1466 = vmatprep.mubr.msk.bf16.mxu1 %vm1609_vm2, %v1608_v3 }
 0x14f   : > { %1452 = vmatprep.subr.bf16.mxu1 %v1608_v3 }
 0x152   : > { %1453 = vmatpush3.bf16.msra.mxu1 %v1569_v20 }
 0x153   : > { %1454 = vmatprep.subr.bf16.mxu1 %v1608_v3 }
 0x156   : > { %1455 = vmatpush3.bf16.msra.mxu1 %v1570_v21 }
 0x157   : > { %1456 = vmatprep.subr.bf16.mxu1 %v1608_v3 }
 0x15a   : > { %1457 = vmatpush3.bf16.msra.mxu1 %v1571_v22 }
 0x15b   : > { %1458 = vmatprep.subr.bf16.mxu1 %v1608_v3 }
 0x15e   : > { %1459 = vmatpush3.bf16.msra.mxu1 %v1572_v23 }
 0x15f   : > { %1460 = vmatprep.subr.bf16.mxu1 %v1608_v3 }
 0x162   : > { %1461 = vmatpush3.bf16.msra.mxu1 %v1573_v24 }
 0x163   : > { %1462 = vmatprep.subr.bf16.mxu1 %v1608_v3 }
 0x166   : > { %1463 = vmatpush3.bf16.msra.mxu1 %v1574_v25 }
 0x167   : > { %1464 = vmatprep.subr.bf16.mxu1 %v1608_v3 }
 0x16a   : > { %1465 = vmatpush3.bf16.msra.mxu1 %v1575_v26 }
 0x16b   : > { %1470 = vmatprep.subr.bf16.mxu1 %v1608_v3 }
 0x16d   : > { %1467 = vmatmul.mubr.msk.bf16.vlgmr.msra.gmra.mrb[0].mxu1 %vm1281_vm6, %v1282_v8 }
 0x16e   : > { %1471 = vmatpush3.bf16.msra.mxu1 %v1576_v27  ;;  %1486 = vmatprep.mubr.msk.bf16.mxu1 %vm1609_vm2, %v1608_v3 }
 0x16f   : > { %1472 = vmatprep.subr.bf16.mxu1 %v1608_v3 }
 0x172   : > { %1473 = vmatpush3.bf16.msra.mxu1 %v1577_v28 }
 0x173   : > { %1474 = vmatprep.subr.bf16.mxu1 %v1608_v3 }
 0x176   : > { %1475 = vmatpush3.bf16.msra.mxu1 %v1578_v29 }
 0x177   : > { %1476 = vmatprep.subr.bf16.mxu1 %v1608_v3 }
 0x17a   : > { %1477 = vmatpush3.bf16.msra.mxu1 %v1579_v30 }
 0x17b   : > { %1478 = vmatprep.subr.bf16.mxu1 %v1608_v3 }
 0x17e   : > { %1479 = vmatpush3.bf16.msra.mxu1 %v1580_v31 }
 0x17f   : > { %1480 = vmatprep.subr.bf16.mxu1 %v1608_v3 }
 0x182   : > { %1481 = vmatpush3.bf16.msra.mxu1 %v1581_v32 }
 0x183   : > { %1482 = vmatprep.subr.bf16.mxu1 %v1608_v3 }
 0x186   : > { %1483 = vmatpush3.bf16.msra.mxu1 %v1582_v33 }
 0x187   : > { %1484 = vmatprep.subr.bf16.mxu1 %v1608_v3 }
 0x18a   : > { %1485 = vmatpush3.bf16.msra.mxu1 %v1583_v34 }
 0x18d   : > { %1487 = vmatmul.mubr.bf16.vlgmr.msra.gmra.mrb[0].mxu1 %v983_v15 }
 0x260   : > { %v1067_v36 = vpop.f32.mrb[0].mxu1 }
 0x261   : > { %v1083_v38 = vmul.f32 %v1308_v35, %v1067_v36  ;;  %v1488_v39 = vpop.f32.mrb[1].mxu1 }
 0x262   : > { %v1070_v40 = vpop.f32.mrb[2].mxu1 }
 0x263   : > { %v1092_v41 = vadd.f32 %v1309_v37, %v1083_v38  ;;  %v1084_v42 = vmul.f32 %v1308_v35, %v1070_v40  ;;  %v1489_v43 = vpop.f32.mrb[3].mxu1 }
 0x265   : > { %v1094_v3 = vmax.f32 %v1092_v41, 0.0  ;;  %v1093_v44 = vadd.f32 %v1309_v37, %v1084_v42 }
 0x267   : > { %1096 = vst [vmem:[%s300_s21] sm:$0xff] %v1094_v3  ;;  %v1095_v45 = vmax.f32 %v1093_v44, 0.0 }
 0x269   : > { %1097 = vst [vmem:[%s300_s21 + $0x8] sm:$0xff] %v1095_v45 }
 0x26a PF: > { %s17_s26 = sadd.s32 1, %s1606_s26   ;;  %s1900_s24 = smov %s1602_s25 }
 0x26b   : > { %p14_p5 = scmp.ge.s32.totalorder %s17_s26, 4   ;;  %s1901_s25 = smov %s1903_s27 }
 0x26d   :  { %16 = sbr.rel (!%p14_p5) target bundleno = 2 (0x2), region = 83 }

</bundles_post_ra>
